<compile_context>
chip_gen: v7x
topology: tpu7x:2x2x1
jax: 0.10.0
libtpu: 0.0.40
codegen_flags: <defaults>
</compile_context>

<pallas_src>
import functools

import jax
import jax.numpy as jnp
from jax.experimental import pallas as pl
from jax.experimental.pallas import tpu as pltpu


def basic_block_kernel(x_ref, w1_ref, w2_ref, bn_ref, out_ref, *, img_rows):
    """Fused conv1+bn1+relu -> conv2+bn2 -> +identity -> relu on a row block.

    x_ref/out_ref: (R, W*C) lane-dense slabs, R = images_per_block * H rows.
    w*_ref:        (W*Cin, 3*W*Cout) banded conv weights; the 3 row taps (ky)
                   are concatenated along the output lane dimension.
    bn_ref:        (4, W*C) folded BN rows: [scale1, shift1, scale2, shift2].
    """
    R, WC = out_ref.shape
    H = img_rows

    x = x_ref[...]                                    # (R, WC) float32

    # Per-row masks: does this row have a valid row above / below it *within
    # its own image*?  (Also kills the circular wrap of the rolls.)
    row = jax.lax.broadcasted_iota(jnp.int32, (R, WC), 0) % H
    not_top = row >= 1
    not_bot = row <= H - 2

    def conv3x3_same(inp, w_ref):
        # Single MXU push covering all 3 row taps (K=WC, N=3*WC).  The ky row
        # shift is applied to the outputs via XLU rolls + masks, so the LHS
        # stays tile-aligned (no padded scratch, no sublane-offset loads).
        y = jnp.dot(inp, w_ref[...], preferred_element_type=jnp.float32)
        a = y[:, 0 * WC:1 * WC]                       # ky = 0 tap (row above)
        b = y[:, 1 * WC:2 * WC]                       # ky = 1 tap (same row)
        c = y[:, 2 * WC:3 * WC]                       # ky = 2 tap (row below)
        down = jnp.where(not_top, pltpu.roll(a, shift=1, axis=0), 0.0)
        up = jnp.where(not_bot, pltpu.roll(c, shift=R - 1, axis=0), 0.0)
        return b + down + up

    s1 = bn_ref[0:1, :]
    b1 = bn_ref[1:2, :]
    s2 = bn_ref[2:3, :]
    b2 = bn_ref[3:4, :]

    h = jnp.maximum(conv3x3_same(x, w1_ref) * s1 + b1, 0.0)     # conv1+bn1+relu1
    out = conv3x3_same(h, w2_ref) * s2 + b2                     # conv2+bn2
    out_ref[...] = jnp.maximum(out + x, 0.0).astype(out_ref.dtype)  # +id, relu2


def _banded_conv_weights(w_oihw, width):
    """Fold a 3x3 'same' conv weight (Cout,Cin,3,3) into one banded matrix.

    Returns (width*Cin, 3*width*Cout): the three ky row taps concatenated
    along the output dim.  The kx taps and the width-boundary zeroing are
    baked in via shifted block identities, so the conv becomes a single
    matmul followed by two masked row shifts of the output.
    """
    taps = jnp.transpose(w_oihw, (2, 3, 1, 0))        # (3, 3, Cin, Cout)
    mats = []
    for ky in range(3):
        m = 0.0
        for kx in range(3):
            dx = kx - 1
            shift = jnp.eye(width, k=-dx, dtype=w_oihw.dtype)   # S[w+dx, w] = 1
            m = m + jnp.kron(shift, taps[ky, kx])
        mats.append(m)                                # (W*Cin, W*Cout) each
    return jnp.concatenate(mats, axis=1)              # (W*Cin, 3*W*Cout)


def basic_block(x_nchw, w1, w2, bn1, bn2, eps=1e-5, images_per_block=None):
    """x_nchw: (N, Cin, H, W); w1/w2: (Cout, Cin, 3, 3) OIHW; bn*: (g, b, mean, var)."""
    g1, be1, m1, v1 = bn1
    g2, be2, m2, v2 = bn2
    s1 = g1 / jnp.sqrt(v1 + eps)
    sh1 = be1 - m1 * s1
    s2 = g2 / jnp.sqrt(v2 + eps)
    sh2 = be2 - m2 * s2

    N, Cin, H, W = x_nchw.shape
    Cout = w1.shape[0]
    assert Cin == Cout, "identity residual path requires Cin == Cout"
    WC = W * Cout

    if images_per_block is None:
        # Largest divisor of N whose row block stays a nice MXU M (<= 128 rows).
        images_per_block = 1
        for nb in range(1, N + 1):
            if N % nb == 0 and nb * H <= 128:
                images_per_block = nb
    NB = images_per_block
    assert N % NB == 0
    R = NB * H
    assert R % 8 == 0 or R == N * H, "row block must be sublane-aligned"

    # NCHW -> lane-dense (N*H, W*C) slab; lanes index (w, c), rows index (n, h).
    x2d = jnp.transpose(x_nchw, (0, 2, 3, 1)).reshape(N * H, W * Cin)

    wb1 = _banded_conv_weights(w1, W).astype(jnp.float32)   # (W*Cin, 3*WC)
    wb2 = _banded_conv_weights(w2, W).astype(jnp.float32)   # (WC,    3*WC)

    # Folded BN params, tiled to lane-aligned (4, W*C): [s1, b1, s2, b2].
    bn_packed = jnp.stack([jnp.tile(s1, W), jnp.tile(sh1, W),
                           jnp.tile(s2, W), jnp.tile(sh2, W)], axis=0)

    kernel = functools.partial(basic_block_kernel, img_rows=H)

    out2d = pl.pallas_call(
        kernel,
        out_shape=jax.ShapeDtypeStruct((N * H, WC), x2d.dtype),
        grid=(N // NB,),
        in_specs=[
            pl.BlockSpec((R, W * Cin), lambda i: (i, 0)),       # activations
            pl.BlockSpec((W * Cin, 3 * WC), lambda i: (0, 0)),  # banded w1
            pl.BlockSpec((WC, 3 * WC), lambda i: (0, 0)),       # banded w2
            pl.BlockSpec((4, WC), lambda i: (0, 0)),            # folded BN
        ],
        out_specs=pl.BlockSpec((R, WC), lambda i: (i, 0)),
        compiler_params=pltpu.CompilerParams(
            dimension_semantics=("parallel",)),
    )(x2d, wb1, wb2, bn_packed)

    out = out2d.reshape(N, H, W, Cout)
    return jnp.transpose(out, (0, 3, 1, 2))                     # -> NCHW


def ref_basic_block(x_nchw, w1, w2, bn1, bn2, eps=1e-5):
    """Pure-JAX reference matching the PyTorch forward (eval-mode BN)."""
    def conv(x, w):
        return jax.lax.conv_general_dilated(
            x, w, window_strides=(1, 1), padding="SAME",
            dimension_numbers=("NCHW", "OIHW", "NCHW"))

    def bn(x, p):
        g, b, m, v = p
        return ((x - m[None, :, None, None])
                / jnp.sqrt(v[None, :, None, None] + eps)
                * g[None, :, None, None] + b[None, :, None, None])

    out = jax.nn.relu(bn(conv(x_nchw, w1), bn1))
    out = bn(conv(out, w2), bn2)
    return jax.nn.relu(out + x_nchw)


if __name__ == "__main__":
    # BasicBlock(inplanes=8, planes=8, stride=1, downsample=None)
    N, C, H, W = 2, 8, 16, 16
    key = jax.random.PRNGKey(0)
    kx, kw1, kw2, kg1, kb1, km1, kv1, kg2, kb2, km2, kv2 = jax.random.split(key, 11)

    x = jax.random.normal(kx, (N, C, H, W), jnp.float32)
    w1 = jax.random.normal(kw1, (C, C, 3, 3), jnp.float32) * 0.1
    w2 = jax.random.normal(kw2, (C, C, 3, 3), jnp.float32) * 0.1
    bn1 = (jax.random.uniform(kg1, (C,), jnp.float32, 0.5, 1.5),
           jax.random.normal(kb1, (C,), jnp.float32) * 0.1,
           jax.random.normal(km1, (C,), jnp.float32) * 0.1,
           jax.random.uniform(kv1, (C,), jnp.float32, 0.5, 1.5))
    bn2 = (jax.random.uniform(kg2, (C,), jnp.float32, 0.5, 1.5),
           jax.random.normal(kb2, (C,), jnp.float32) * 0.1,
           jax.random.normal(km2, (C,), jnp.float32) * 0.1,
           jax.random.uniform(kv2, (C,), jnp.float32, 0.5, 1.5))

    out = basic_block(x, w1, w2, bn1, bn2)
    out = jax.block_until_ready(out)

    ref = jax.block_until_ready(ref_basic_block(x, w1, w2, bn1, bn2))
    assert out.shape == (N, C, H, W)
    assert jnp.allclose(out, ref, atol=1e-4, rtol=1e-4), "mismatch vs reference"

    print("KERNEL_OK")
</pallas_src>

<mosaic_0001>
module attributes {stable_mosaic.version = 11 : i64} {
  func.func @basic_block_kernel(%arg0: i32, %arg1: memref<32x128xf32, #tpu.memory_space<vmem>>, %arg2: memref<128x384xf32, #tpu.memory_space<vmem>>, %arg3: memref<128x384xf32, #tpu.memory_space<vmem>>, %arg4: memref<4x128xf32, #tpu.memory_space<vmem>>, %arg5: memref<32x128xf32, #tpu.memory_space<vmem>>) attributes {dimension_semantics = [#tpu.dimension_semantics<parallel>], iteration_bounds = array<i64: 1>, scalar_prefetch = 0 : i64, scratch_operands = 0 : i64, tpu.core_type = #tpu.core_type<tc>, window_params = [{transform_indices = @transform_0, window_bounds = array<i64: 32, 128>}, {pipeline_mode = #tpu.pipeline_mode<synchronous>, transform_indices = @transform_1, window_bounds = array<i64: 128, 384>}, {pipeline_mode = #tpu.pipeline_mode<synchronous>, transform_indices = @transform_2, window_bounds = array<i64: 128, 384>}, {pipeline_mode = #tpu.pipeline_mode<synchronous>, transform_indices = @transform_3, window_bounds = array<i64: 4, 128>}, {transform_indices = @transform_4, window_bounds = array<i64: 32, 128>}]} {
    %c0 = arith.constant 0 : index
    %c0_0 = arith.constant 0 : index
    %0 = vector.load %arg1[%c0, %c0_0] : memref<32x128xf32, #tpu.memory_space<vmem>>, vector<32x128xf32>
    %1 = tpu.iota {dimensions = array<i32: 0>} : vector<32x128xi32>
    %c16_i32 = arith.constant 16 : i32
    %c0_i32 = arith.constant 0 : i32
    %2 = arith.cmpi eq, %c16_i32, %c0_i32 : i32
    %c1_i32 = arith.constant 1 : i32
    %3 = arith.select %2, %c1_i32, %c16_i32 : i32
    %4 = vector.broadcast %3 : i32 to vector<32x128xi32>
    %5 = arith.remsi %1, %4 : vector<32x128xi32>
    %c0_i32_1 = arith.constant 0 : i32
    %6 = vector.broadcast %c0_i32_1 : i32 to vector<32x128xi32>
    %7 = arith.cmpi ne, %5, %6 : vector<32x128xi32>
    %c0_i32_2 = arith.constant 0 : i32
    %8 = vector.broadcast %c0_i32_2 : i32 to vector<32x128xi32>
    %9 = arith.cmpi slt, %5, %8 : vector<32x128xi32>
    %c0_i32_3 = arith.constant 0 : i32
    %10 = arith.cmpi slt, %3, %c0_i32_3 : i32
    %11 = vector.broadcast %10 : i1 to vector<32x128xi1>
    %12 = vector.broadcast %11 : vector<32x128xi1> to vector<32x128xi1>
    %13 = arith.xori %9, %12 : vector<32x128xi1>
    %14 = arith.andi %13, %7 : vector<32x128xi1>
    %15 = vector.broadcast %3 : i32 to vector<32x128xi32>
    %16 = arith.addi %5, %15 : vector<32x128xi32>
    %17 = arith.select %14, %16, %5 : vector<32x128xi1>, vector<32x128xi32>
    %c1_i32_4 = arith.constant 1 : i32
    %18 = vector.broadcast %c1_i32_4 : i32 to vector<32x128xi32>
    %19 = arith.cmpi sge, %17, %18 : vector<32x128xi32>
    %c14_i32 = arith.constant 14 : i32
    %20 = vector.broadcast %c14_i32 : i32 to vector<32x128xi32>
    %21 = arith.cmpi sle, %17, %20 : vector<32x128xi32>
    %c0_5 = arith.constant 0 : index
    %c0_6 = arith.constant 0 : index
    %22 = vector.load %arg4[%c0_5, %c0_6] : memref<4x128xf32, #tpu.memory_space<vmem>>, vector<1x128xf32>
    %c1 = arith.constant 1 : index
    %c0_7 = arith.constant 0 : index
    %23 = vector.load %arg4[%c1, %c0_7] : memref<4x128xf32, #tpu.memory_space<vmem>>, vector<1x128xf32>
    %c2 = arith.constant 2 : index
    %c0_8 = arith.constant 0 : index
    %24 = vector.load %arg4[%c2, %c0_8] : memref<4x128xf32, #tpu.memory_space<vmem>>, vector<1x128xf32>
    %c3 = arith.constant 3 : index
    %c0_9 = arith.constant 0 : index
    %25 = vector.load %arg4[%c3, %c0_9] : memref<4x128xf32, #tpu.memory_space<vmem>>, vector<1x128xf32>
    %c0_10 = arith.constant 0 : index
    %c0_11 = arith.constant 0 : index
    %26 = vector.load %arg2[%c0_10, %c0_11] : memref<128x384xf32, #tpu.memory_space<vmem>>, vector<128x384xf32>
    %cst = arith.constant dense<0.000000e+00> : vector<32x384xf32>
    %27 = tpu.matmul %0, %26, %cst {dimension_numbers = #tpu.dot_dimension_numbers<[1], [0], [0], [1], [0, 0, 1, 1], [], []>} : vector<32x128xf32>, vector<128x384xf32>, vector<32x384xf32> -> vector<32x384xf32>
    %28 = vector.extract_strided_slice %27 {offsets = [0, 0], sizes = [32, 128], strides = [1, 1]} : vector<32x384xf32> to vector<32x128xf32>
    %29 = vector.extract_strided_slice %27 {offsets = [0, 128], sizes = [32, 128], strides = [1, 1]} : vector<32x384xf32> to vector<32x128xf32>
    %30 = vector.extract_strided_slice %27 {offsets = [0, 256], sizes = [32, 128], strides = [1, 1]} : vector<32x384xf32> to vector<32x128xf32>
    %c1_i32_12 = arith.constant 1 : i32
    %31 = tpu.dynamic_rotate %28 by %c1_i32_12 dim 0 : vector<32x128xf32>, i32 -> vector<32x128xf32>
    %cst_13 = arith.constant 0.000000e+00 : f32
    %32 = vector.broadcast %cst_13 : f32 to vector<32x128xf32>
    %33 = arith.select %19, %31, %32 : vector<32x128xi1>, vector<32x128xf32>
    %c31_i32 = arith.constant 31 : i32
    %34 = tpu.dynamic_rotate %30 by %c31_i32 dim 0 : vector<32x128xf32>, i32 -> vector<32x128xf32>
    %cst_14 = arith.constant 0.000000e+00 : f32
    %35 = vector.broadcast %cst_14 : f32 to vector<32x128xf32>
    %36 = arith.select %21, %34, %35 : vector<32x128xi1>, vector<32x128xf32>
    %37 = arith.addf %29, %33 : vector<32x128xf32>
    %38 = arith.addf %37, %36 : vector<32x128xf32>
    %39 = vector.broadcast %22 : vector<1x128xf32> to vector<32x128xf32>
    %40 = arith.mulf %38, %39 : vector<32x128xf32>
    %41 = vector.broadcast %23 : vector<1x128xf32> to vector<32x128xf32>
    %42 = arith.addf %40, %41 : vector<32x128xf32>
    %cst_15 = arith.constant 0.000000e+00 : f32
    %43 = vector.broadcast %cst_15 : f32 to vector<32x128xf32>
    %44 = arith.maximumf %42, %43 : vector<32x128xf32>
    %c0_16 = arith.constant 0 : index
    %c0_17 = arith.constant 0 : index
    %45 = vector.load %arg3[%c0_16, %c0_17] : memref<128x384xf32, #tpu.memory_space<vmem>>, vector<128x384xf32>
    %cst_18 = arith.constant dense<0.000000e+00> : vector<32x384xf32>
    %46 = tpu.matmul %44, %45, %cst_18 {dimension_numbers = #tpu.dot_dimension_numbers<[1], [0], [0], [1], [0, 0, 1, 1], [], []>} : vector<32x128xf32>, vector<128x384xf32>, vector<32x384xf32> -> vector<32x384xf32>
    %47 = vector.extract_strided_slice %46 {offsets = [0, 0], sizes = [32, 128], strides = [1, 1]} : vector<32x384xf32> to vector<32x128xf32>
    %48 = vector.extract_strided_slice %46 {offsets = [0, 128], sizes = [32, 128], strides = [1, 1]} : vector<32x384xf32> to vector<32x128xf32>
    %49 = vector.extract_strided_slice %46 {offsets = [0, 256], sizes = [32, 128], strides = [1, 1]} : vector<32x384xf32> to vector<32x128xf32>
    %c1_i32_19 = arith.constant 1 : i32
    %50 = tpu.dynamic_rotate %47 by %c1_i32_19 dim 0 : vector<32x128xf32>, i32 -> vector<32x128xf32>
    %cst_20 = arith.constant 0.000000e+00 : f32
    %51 = vector.broadcast %cst_20 : f32 to vector<32x128xf32>
    %52 = arith.select %19, %50, %51 : vector<32x128xi1>, vector<32x128xf32>
    %c31_i32_21 = arith.constant 31 : i32
    %53 = tpu.dynamic_rotate %49 by %c31_i32_21 dim 0 : vector<32x128xf32>, i32 -> vector<32x128xf32>
    %cst_22 = arith.constant 0.000000e+00 : f32
    %54 = vector.broadcast %cst_22 : f32 to vector<32x128xf32>
    %55 = arith.select %21, %53, %54 : vector<32x128xi1>, vector<32x128xf32>
    %56 = arith.addf %48, %52 : vector<32x128xf32>
    %57 = arith.addf %56, %55 : vector<32x128xf32>
    %58 = vector.broadcast %24 : vector<1x128xf32> to vector<32x128xf32>
    %59 = arith.mulf %57, %58 : vector<32x128xf32>
    %60 = vector.broadcast %25 : vector<1x128xf32> to vector<32x128xf32>
    %61 = arith.addf %59, %60 : vector<32x128xf32>
    %62 = arith.addf %61, %0 : vector<32x128xf32>
    %cst_23 = arith.constant 0.000000e+00 : f32
    %63 = vector.broadcast %cst_23 : f32 to vector<32x128xf32>
    %64 = arith.maximumf %62, %63 : vector<32x128xf32>
    %c0_24 = arith.constant 0 : index
    %c0_25 = arith.constant 0 : index
    %65 = vector.load %arg5[%c0_24, %c0_25] : memref<32x128xf32, #tpu.memory_space<vmem>>, vector<32x128xf32>
    tpu.vector_store %arg5[%c0_24, %c0_25], %64 {strides = array<i32>} : memref<32x128xf32, #tpu.memory_space<vmem>>, vector<32x128xf32>,
    return
  }
  func.func @transform_0(%arg0: i32) -> (i32, i32) {
    %c0_i32 = arith.constant 0 : i32
    %c0_i32_0 = arith.constant 0 : i32
    return %arg0, %c0_i32 : i32, i32
  }
  func.func @transform_1(%arg0: i32) -> (i32, i32) {
    %c0_i32 = arith.constant 0 : i32
    %c0_i32_0 = arith.constant 0 : i32
    %c0_i32_1 = arith.constant 0 : i32
    return %c0_i32, %c0_i32_0 : i32, i32
  }
  func.func @transform_2(%arg0: i32) -> (i32, i32) {
    %c0_i32 = arith.constant 0 : i32
    %c0_i32_0 = arith.constant 0 : i32
    %c0_i32_1 = arith.constant 0 : i32
    return %c0_i32, %c0_i32_0 : i32, i32
  }
  func.func @transform_3(%arg0: i32) -> (i32, i32) {
    %c0_i32 = arith.constant 0 : i32
    %c0_i32_0 = arith.constant 0 : i32
    %c0_i32_1 = arith.constant 0 : i32
    return %c0_i32, %c0_i32_0 : i32, i32
  }
  func.func @transform_4(%arg0: i32) -> (i32, i32) {
    %c0_i32 = arith.constant 0 : i32
    %c0_i32_0 = arith.constant 0 : i32
    return %arg0, %c0_i32 : i32, i32
  }
}

</mosaic_0001>

<bundles_post_ra>
// kernel: tpu_custom_call.1
= control target key start
LH: loop header
LB: loop body
LE: loop exit
PB: predicated region body
PF: predicated region fallthrough
CT: control target
= control target key end

     0   :  { %9 = vsyncpa [#allocation3], 0  ;;  %s1261_s0 = inlined_call_operand.hbm [shape: f32[32,128], index: 0, kind: input, shape index: {}]   ;;  %s1262_s1 = inlined_call_operand.hbm [shape: f32[128,384], index: 1, kind: input, shape index: {}]   ;;  %s1263_s2 = inlined_call_operand.hbm [shape: f32[128,384], index: 2, kind: input, shape index: {}]   ;;  %s1264_s3 = inlined_call_operand.vmem [shape: f32[4,128], index: 3, kind: input, shape index: {}]   ;;  %s1265_s4 = inlined_call_operand.hbm [shape: f32[32,128], index: 4, kind: output, shape index: {}]  }
   0x1   :  { %10 = vsyncpa [#allocation6], 0 }
   0x2   :  { %11 = vsyncpa [#allocation4], 0  ;;  %s1055_s15 = smov [#allocation5]   ;;  %s961_s19 = scalar_lea.hbm %s1262_s1, 6144 }
   0x3   :  { %s29_s16 = sshll.u32 %s1055_s15, 4  ;;  %p962_p0 = scmp.ne.s32.totalorder %s1262_s1, %s961_s19  ;;  %s30_s16 = int_to_ptr.vmem [resolvable:$true] %s29_s16 }
   0x4   :  { %p965_p1 = scmp.lt.u32.totalorder %s961_s19, %s1262_s1 }
   0x6   :  { %p967_p2 = pnand %p965_p1, %p962_p0 }
   0x8   :  { %970 = shalt.err (!%p967_p2)
}
   0x9   :  { %s971_s24 = scalar_lea.vmem %s30_s16, 6144  ;;  %p976_p4 = scmp.lt.s32.totalorder %s30_s16, %s30_s16 }
   0xa   :  { %p972_p3 = scmp.ne.s32.totalorder %s30_s16, %s971_s24  ;;  %p977_p5 = scmp.lt.s32.totalorder %s971_s24, %s971_s24 }
   0xc   :  { %p978_p6 = por %p977_p5, %p976_p4 }
   0xe   :  { %p979_p7 = pnand %p978_p6, %p972_p3 }
  0x10   :  { %982 = shalt.err (!%p979_p7)
}
  0x11   :  { %s1056_s25 = smov 384   ;;  %s1057_s26 = smov 24  }
  0x12   :  { %35 = dma.hbm_to_vmem [thread:$0]  %s1262_s1, 6144, %s30_s16, [#allocation6], %s1056_s25, %s1056_s25, %s1057_s26  }
  0x13   :  { %s1058_s29 = smov [#allocation2]   ;;  %s983_s7 = scalar_lea.hbm %s1261_s0, 512 }
  0x14   :  { %s17_s30 = sshll.u32 %s1058_s29, 4  ;;  %p984_p8 = scmp.ne.s32.totalorder %s1261_s0, %s983_s7  ;;  %s18_s30 = int_to_ptr.vmem [resolvable:$true] %s17_s30 }
  0x15   :  { %p987_p9 = scmp.lt.u32.totalorder %s983_s7, %s1261_s0 }
  0x17   :  { %p989_p10 = pnand %p987_p9, %p984_p8 }
  0x19   :  { %992 = shalt.err (!%p989_p10)
}
  0x1a   :  { %s993_s12 = scalar_lea.vmem %s18_s30, 512  ;;  %p998_p12 = scmp.lt.s32.totalorder %s18_s30, %s18_s30 }
  0x1b   :  { %p994_p11 = scmp.ne.s32.totalorder %s18_s30, %s993_s12  ;;  %p999_p13 = scmp.lt.s32.totalorder %s993_s12, %s993_s12 }
  0x1d   :  { %p1000_p0 = por %p999_p13, %p998_p12 }
  0x1f   :  { %p1001_p1 = pnand %p1000_p0, %p994_p11 }
  0x21   :  { %1004 = shalt.err (!%p1001_p1)
}
  0x22   :  { %s1059_s1 = smov 128   ;;  %s1060_s13 = smov 8  }
  0x23   :  { %23 = dma.hbm_to_vmem [thread:$0]  %s1261_s0, 512, %s18_s30, [#allocation3], %s1059_s1, %s1059_s1, %s1060_s13  }
  0x24   :  { %s1061_s16 = smov [#allocation7]   ;;  %s1005_s20 = scalar_lea.hbm %s1263_s2, 6144 }
  0x25   :  { %s41_s17 = sshll.u32 %s1061_s16, 4  ;;  %p1006_p2 = scmp.ne.s32.totalorder %s1263_s2, %s1005_s20  ;;  %s42_s17 = int_to_ptr.vmem [resolvable:$true] %s41_s17 }
  0x26   :  { %p1009_p3 = scmp.lt.u32.totalorder %s1005_s20, %s1263_s2 }
  0x28   :  { %p1011_p4 = pnand %p1009_p3, %p1006_p2 }
  0x2a   :  { %1014 = shalt.err (!%p1011_p4)
}
  0x2b   :  { %s1015_s27 = scalar_lea.vmem %s42_s17, 6144  ;;  %p1020_p6 = scmp.lt.s32.totalorder %s42_s17, %s42_s17 }
  0x2c   :  { %p1016_p5 = scmp.ne.s32.totalorder %s42_s17, %s1015_s27  ;;  %p1021_p7 = scmp.lt.s32.totalorder %s1015_s27, %s1015_s27 }
  0x2e   :  { %p1022_p8 = por %p1021_p7, %p1020_p6 }
  0x30   :  { %p1023_p9 = pnand %p1022_p8, %p1016_p5 }
  0x32   :  { %1026 = shalt.err (!%p1023_p9)
}
  0x33   :  { %47 = dma.hbm_to_vmem [thread:$0]  %s1263_s2, 6144, %s42_s17, [#allocation6], %s1056_s25, %s1056_s25, %s1057_s26  }
  0x34   :  { %1049 = dma.done.wait [#allocation3], 512  }
  0x35   :  { %1050 = vsyncadd [#allocation3], 4294966784 }
  0x36   :  { %1051 = dma.done.wait [#allocation6], 12288  }
  0x37   :  { %1052 = vsyncadd [#allocation6], 4294955008  ;;  %v1062_v0 = vmov 0.0   ;;  %v129_v1 = vld [vmem:[#allocation5 + $0x8] sm:$0xff]  ;;  %v132_v2 = vld [vmem:[#allocation5 + $0x20] sm:$0xff] }
  0x38   :  { %240 = vmatprep.mubr.f32.mxu0 %v1062_v0  ;;  %v130_v3 = vld [vmem:[#allocation5 + $0x10] sm:$0xff]  ;;  %v824_v4 = vpack.c.bf16 %v132_v2, %v129_v1  ;;  %v133_v5 = vld [vmem:[#allocation5 + $0x28] sm:$0xff]  ;;  %v128_v6 = vld [vmem:[#allocation5] sm:$0xff] }
  0x39   :  { %v131_v7 = vld [vmem:[#allocation5 + $0x18] sm:$0xff]  ;;  %v856_v8 = vpack.c.bf16 %v133_v5, %v130_v3  ;;  %v138_v11 = vld [vmem:[#allocation5 + $0x50] sm:$0xff]  ;;  %v136_v12 = vld [vmem:[#allocation5 + $0x40] sm:$0xff] }
  0x3a   :  { %v826_v9 = vpack.c.bf16 %v131_v7, %v128_v6  ;;  %v135_v10 = vld [vmem:[#allocation5 + $0x38] sm:$0xff]  ;;  %825 = vmatprep.subr.bf16.mxu0 %v824_v4  ;;  %v134_v15 = vld [vmem:[#allocation5 + $0x30] sm:$0xff]  ;;  %v137_v16 = vld [vmem:[#allocation5 + $0x48] sm:$0xff] }
  0x3b   :  { %v828_v13 = vpack.c.bf16 %v138_v11, %v135_v10  ;;  %v139_v14 = vld [vmem:[#allocation5 + $0x58] sm:$0xff]  ;;  %857 = vmatprep.subr.bf16.mxu1 %v856_v8  ;;  %v830_v18 = vpack.c.bf16 %v137_v16, %v134_v15  ;;  %v141_v19 = vld [vmem:[#allocation5 + $0x68] sm:$0xff]  ;;  %v144_v20 = vld [vmem:[#allocation5 + $0x80] sm:$0xff] }
  0x3c   :  { %827 = vmatpush1.bf16.msra.mxu0 %v826_v9  ;;  %v860_v17 = vpack.c.bf16 %v139_v14, %v136_v12  ;;  %v142_v21 = vld [vmem:[#allocation5 + $0x70] sm:$0xff]  ;;  %859 = vmatpush3.bf16.msra.mxu1 %v856_v8  ;;  %v832_v22 = vpack.c.bf16 %v144_v20, %v141_v19  ;;  %v145_v23 = vld [vmem:[#allocation5 + $0x88] sm:$0xff]  ;;  %v140_v24 = vld [vmem:[#allocation5 + $0x60] sm:$0xff] }
  0x3d   :  { %829 = vmatprep.subr.bf16.mxu0 %v828_v13  ;;  %v143_v25 = vld [vmem:[#allocation5 + $0x78] sm:$0xff]  ;;  %v864_v26 = vpack.c.bf16 %v145_v23, %v142_v21  ;;  %v150_v28 = vld [vmem:[#allocation5 + $0xb0] sm:$0xff]  ;;  %v148_v29 = vld [vmem:[#allocation5 + $0xa0] sm:$0xff] }
  0x3e   :  { %861 = vmatprep.subr.bf16.mxu1 %v860_v17  ;;  %v147_v27 = vld [vmem:[#allocation5 + $0x98] sm:$0xff]  ;;  %v834_v31 = vpack.c.bf16 %v143_v25, %v140_v24  ;;  %v146_v33 = vld [vmem:[#allocation5 + $0x90] sm:$0xff]  ;;  %v149_v34 = vld [vmem:[#allocation5 + $0xa8] sm:$0xff] }
  0x3f   :  { %v151_v30 = vld [vmem:[#allocation5 + $0xb8] sm:$0xff]  ;;  %v836_v32 = vpack.c.bf16 %v150_v28, %v147_v27  ;;  %v153_v36 = vld [vmem:[#allocation5 + $0xc8] sm:$0xff]  ;;  %v156_v37 = vld [vmem:[#allocation5 + $0xe0] sm:$0xff]  ;;  %v838_v40 = vpack.c.bf16 %v149_v34, %v146_v33 }
  0x40   :  { %831 = vmatpush1.bf16.msra.mxu0 %v830_v18  ;;  %863 = vmatpush3.bf16.msra.mxu1 %v860_v17  ;;  %v868_v35 = vpack.c.bf16 %v151_v30, %v148_v29  ;;  %v154_v38 = vld [vmem:[#allocation5 + $0xd0] sm:$0xff]  ;;  %v157_v39 = vld [vmem:[#allocation5 + $0xe8] sm:$0xff]  ;;  %v840_v41 = vpack.c.bf16 %v156_v37, %v153_v36  ;;  %v152_v42 = vld [vmem:[#allocation5 + $0xc0] sm:$0xff] }
  0x41   :  { %833 = vmatprep.subr.bf16.mxu0 %v832_v22  ;;  %865 = vmatprep.subr.bf16.mxu1 %v864_v26  ;;  %v155_v43 = vld [vmem:[#allocation5 + $0xd8] sm:$0xff]  ;;  %v872_v44 = vpack.c.bf16 %v157_v39, %v154_v38  ;;  %v162_v46 = vld [vmem:[#allocation5 + $0x110] sm:$0xff]  ;;  %v160_v47 = vld [vmem:[#allocation5 + $0x100] sm:$0xff] }
  0x42   :  { %v159_v45 = vld [vmem:[#allocation5 + $0xf8] sm:$0xff]  ;;  %v842_v49 = vpack.c.bf16 %v155_v43, %v152_v42  ;;  %v1135_v50 = vld [vmem:[#allocation2] sm:$0xff]  ;;  %v158_v52 = vld [vmem:[#allocation5 + $0xf0] sm:$0xff] }
  0x43   :  { %v163_v48 = vld [vmem:[#allocation5 + $0x118] sm:$0xff]  ;;  %v844_v51 = vpack.c.bf16 %v162_v46, %v159_v45  ;;  %v161_v53 = vld [vmem:[#allocation5 + $0x108] sm:$0xff]  ;;  %v168_v56 = vld [vmem:[#allocation5 + $0x140] sm:$0xff]  ;;  %780 = vmatprep.mubr.f32.mxu1 %v1135_v50 }
  0x44   :  { %835 = vmatpush1.bf16.msra.mxu0 %v834_v31  ;;  %867 = vmatpush3.bf16.msra.mxu1 %v864_v26  ;;  %v876_v54 = vpack.c.bf16 %v163_v48, %v160_v47  ;;  %v165_v55 = vld [vmem:[#allocation5 + $0x128] sm:$0xff]  ;;  %v166_v57 = vld [vmem:[#allocation5 + $0x130] sm:$0xff]  ;;  %v846_v59 = vpack.c.bf16 %v161_v53, %v158_v52  ;;  %v164_v61 = vld [vmem:[#allocation5 + $0x120] sm:$0xff] }
  0x45   :  { %837 = vmatprep.subr.bf16.mxu0 %v836_v32  ;;  %869 = vmatprep.subr.bf16.mxu1 %v868_v35  ;;  %v169_v58 = vld [vmem:[#allocation5 + $0x148] sm:$0xff]  ;;  %v848_v60 = vpack.c.bf16 %v168_v56, %v165_v55  ;;  %v167_v62 = vld [vmem:[#allocation5 + $0x138] sm:$0xff]  ;;  %v174_v2 = vld [vmem:[#allocation5 + $0x170] sm:$0xff] }
  0x46   :  { %v880_v63 = vpack.c.bf16 %v169_v58, %v166_v57  ;;  %v171_v1 = vld [vmem:[#allocation5 + $0x158] sm:$0xff]  ;;  %v172_v3 = vld [vmem:[#allocation5 + $0x160] sm:$0xff]  ;;  %v850_v5 = vpack.c.bf16 %v167_v62, %v164_v61  ;;  %v170_v7 = vld [vmem:[#allocation5 + $0x150] sm:$0xff] }
  0x47   :  { %v175_v4 = vld [vmem:[#allocation5 + $0x178] sm:$0xff]  ;;  %v852_v6 = vpack.c.bf16 %v174_v2, %v171_v1  ;;  %v173_v8 = vld [vmem:[#allocation5 + $0x168] sm:$0xff]  ;;  %v408_v11 = vld [vmem:[#allocation7 + $0x20] sm:$0xff] }
  0x48   :  { %839 = vmatpush1.bf16.msra.mxu0 %v838_v40  ;;  %871 = vmatpush3.bf16.msra.mxu1 %v868_v35  ;;  %v884_v9 = vpack.c.bf16 %v175_v4, %v172_v3  ;;  %v405_v10 = vld [vmem:[#allocation7 + $0x8] sm:$0xff]  ;;  %v406_v12 = vld [vmem:[#allocation7 + $0x10] sm:$0xff]  ;;  %v854_v14 = vpack.c.bf16 %v173_v8, %v170_v7  ;;  %v404_v16 = vld [vmem:[#allocation7] sm:$0xff] }
  0x49   :  { %841 = vmatprep.subr.bf16.mxu0 %v840_v41  ;;  %873 = vmatprep.subr.bf16.mxu1 %v872_v44  ;;  %v409_v13 = vld [vmem:[#allocation7 + $0x28] sm:$0xff]  ;;  %v888_v15 = vpack.c.bf16 %v408_v11, %v405_v10  ;;  %v407_v17 = vld [vmem:[#allocation7 + $0x18] sm:$0xff]  ;;  %v414_v20 = vld [vmem:[#allocation7 + $0x50] sm:$0xff] }
  0x4a   :  { %v920_v18 = vpack.c.bf16 %v409_v13, %v406_v12  ;;  %v411_v19 = vld [vmem:[#allocation7 + $0x38] sm:$0xff]  ;;  %v1138_v21 = vld [vmem:[#allocation2 + $0x8] sm:$0xff]  ;;  %v890_v22 = vpack.c.bf16 %v407_v17, %v404_v16  ;;  %v1140_v23 = vld [vmem:[#allocation2 + $0x10] sm:$0xff] }
  0x4b   :  { %v892_v24 = vpack.c.bf16 %v414_v20, %v411_v19  ;;  %v1146_v25 = vld [vmem:[#allocation2 + $0x18] sm:$0xff]  ;;  %v410_v26 = vld [vmem:[#allocation7 + $0x30] sm:$0xff]  ;;  %v413_v27 = vld [vmem:[#allocation7 + $0x48] sm:$0xff] }
  0x4c   :  { %843 = vmatpush1.bf16.msra.mxu0 %v842_v49  ;;  %875 = vmatpush3.bf16.msra.mxu1 %v872_v44  ;;  %v412_v28 = vld [vmem:[#allocation7 + $0x40] sm:$0xff]  ;;  %v894_v29 = vpack.c.bf16 %v413_v27, %v410_v26  ;;  %v415_v30 = vld [vmem:[#allocation7 + $0x58] sm:$0xff]  ;;  %v417_v32 = vld [vmem:[#allocation7 + $0x68] sm:$0xff]  ;;  %v63_v27 = vlaneseq }
  0x4d   :  { %845 = vmatprep.subr.bf16.mxu0 %v844_v51  ;;  %877 = vmatprep.subr.bf16.mxu1 %v876_v54  ;;  %v924_v31 = vpack.c.bf16 %v415_v30, %v412_v28  ;;  %v420_v33 = vld [vmem:[#allocation7 + $0x80] sm:$0xff]  ;;  %v419_v36 = vld [vmem:[#allocation7 + $0x78] sm:$0xff]  ;;  %v418_v37 = vld [vmem:[#allocation7 + $0x70] sm:$0xff] }
  0x4e   :  { %v896_v34 = vpack.c.bf16 %v420_v33, %v417_v32  ;;  %v416_v35 = vld [vmem:[#allocation7 + $0x60] sm:$0xff]  ;;  %v421_v39 = vld [vmem:[#allocation7 + $0x88] sm:$0xff]  ;;  %v423_v41 = vld [vmem:[#allocation7 + $0x98] sm:$0xff]  ;;  %v1155_v28 = vshrl.u32 %v63_v27, 7 }
  0x4f   :  { %v898_v38 = vpack.c.bf16 %v419_v36, %v416_v35  ;;  %v928_v40 = vpack.c.bf16 %v421_v39, %v418_v37  ;;  %v426_v42 = vld [vmem:[#allocation7 + $0xb0] sm:$0xff]  ;;  %v425_v45 = vld [vmem:[#allocation7 + $0xa8] sm:$0xff]  ;;  %v424_v46 = vld [vmem:[#allocation7 + $0xa0] sm:$0xff] }
  0x50   :  { %847 = vmatpush1.bf16.msra.mxu0 %v846_v59  ;;  %879 = vmatpush3.bf16.msra.mxu1 %v876_v54  ;;  %v900_v43 = vpack.c.bf16 %v426_v42, %v423_v41  ;;  %v422_v44 = vld [vmem:[#allocation7 + $0x90] sm:$0xff]  ;;  %v427_v48 = vld [vmem:[#allocation7 + $0xb8] sm:$0xff]  ;;  %v429_v51 = vld [vmem:[#allocation7 + $0xc8] sm:$0xff]  ;;  %vm367_vm0 = vcmp.lt.s32.totalorder %v1155_v28, 7  ;;  %vm354_vm1 = vcmp.lt.s32.totalorder %v1155_v28, 1 }
  0x51   :  { %849 = vmatprep.subr.bf16.mxu0 %v848_v60  ;;  %881 = vmatprep.subr.bf16.mxu1 %v880_v63  ;;  %v902_v47 = vpack.c.bf16 %v425_v45, %v422_v44  ;;  %v932_v49 = vpack.c.bf16 %v427_v48, %v424_v46  ;;  %v432_v52 = vld [vmem:[#allocation7 + $0xe0] sm:$0xff]  ;;  %v431_v55 = vld [vmem:[#allocation7 + $0xd8] sm:$0xff]  ;;  %v430_v56 = vld [vmem:[#allocation7 + $0xd0] sm:$0xff] }
  0x52   :  { %v904_v53 = vpack.c.bf16 %v432_v52, %v429_v51  ;;  %v428_v54 = vld [vmem:[#allocation7 + $0xc0] sm:$0xff]  ;;  %v433_v58 = vld [vmem:[#allocation7 + $0xe8] sm:$0xff]  ;;  %v435_v60 = vld [vmem:[#allocation7 + $0xf8] sm:$0xff] }
  0x53   :  { %v906_v57 = vpack.c.bf16 %v431_v55, %v428_v54  ;;  %v936_v59 = vpack.c.bf16 %v433_v58, %v430_v56  ;;  %v438_v61 = vld [vmem:[#allocation7 + $0x110] sm:$0xff]  ;;  %v437_v1 = vld [vmem:[#allocation7 + $0x108] sm:$0xff]  ;;  %v436_v2 = vld [vmem:[#allocation7 + $0x100] sm:$0xff] }
  0x54   :  { %851 = vmatpush1.bf16.msra.mxu0 %v850_v5  ;;  %883 = vmatpush3.bf16.msra.mxu1 %v880_v63  ;;  %v908_v62 = vpack.c.bf16 %v438_v61, %v435_v60  ;;  %v434_v63 = vld [vmem:[#allocation7 + $0xf0] sm:$0xff]  ;;  %v439_v4 = vld [vmem:[#allocation7 + $0x118] sm:$0xff]  ;;  %v444_v7 = vld [vmem:[#allocation7 + $0x140] sm:$0xff]  ;;  %v72_v61 = vand.u32 15, %v1155_v28 }
  0x55   :  { %853 = vmatprep.subr.bf16.mxu0 %v852_v6  ;;  %885 = vmatprep.subr.bf16.mxu1 %v884_v9  ;;  %v910_v3 = vpack.c.bf16 %v437_v1, %v434_v63  ;;  %v940_v5 = vpack.c.bf16 %v439_v4, %v436_v2  ;;  %v441_v6 = vld [vmem:[#allocation7 + $0x128] sm:$0xff]  ;;  %v443_v10 = vld [vmem:[#allocation7 + $0x138] sm:$0xff]  ;;  %v442_v11 = vld [vmem:[#allocation7 + $0x130] sm:$0xff] }
  0x56   :  { %v912_v8 = vpack.c.bf16 %v444_v7, %v441_v6  ;;  %v445_v13 = vld [vmem:[#allocation7 + $0x148] sm:$0xff]  ;;  %v450_v16 = vld [vmem:[#allocation7 + $0x170] sm:$0xff]  ;;  %v448_v20 = vld [vmem:[#allocation7 + $0x160] sm:$0xff]  ;;  %vm1191_vm5 = vcmp.ge.s32.totalorder %v72_v61, 1 }
  0x57   :  { %v446_v17 = vld [vmem:[#allocation7 + $0x150] sm:$0xff]  ;;  %v449_v19 = vld [vmem:[#allocation7 + $0x168] sm:$0xff]  ;;  %v706_v61 = vld [vmem:[%s1264_s3 + $0x2] ss:$0 sm:$0xff] }
  0x58   :  { %855 = vmatpush1.bf16.msra.mxu0 %v854_v14  ;;  %887 = vmatpush3.bf16.msra.mxu1 %v884_v9  ;;  %v440_v9 = vld [vmem:[#allocation7 + $0x120] sm:$0xff]  ;;  %v944_v14 = vpack.c.bf16 %v445_v13, %v442_v11 }
  0x59   :  { %889 = vmatprep.subr.bf16.mxu0 %v888_v15  ;;  %921 = vmatprep.subr.bf16.mxu1 %v920_v18  ;;  %v914_v12 = vpack.c.bf16 %v443_v10, %v440_v9  ;;  %v447_v15 = vld [vmem:[#allocation7 + $0x158] sm:$0xff]  ;;  %v704_v9 = vld [vmem:[%s1264_s3] ss:$0 sm:$0xff] }
  0x5b   :  { %241 = vmatmul.mubr.f32.vlgmr.msra.gmra.mrb[0].mxu0 %v1135_v50  ;;  %781 = vmatmul.mubr.f32.vlgmr.msra.gmra.mrb[0].mxu1 %v1138_v21 }
  0x5c   :  { %246 = vmatprep.mubr.f32.mxu0 %v1062_v0  ;;  %783 = vmatprep.mubr.f32.mxu1 %v1140_v23 }
  0x5d   :  { %891 = vmatpush1.bf16.msra.mxu0 %v890_v22  ;;  %923 = vmatpush3.bf16.msra.mxu1 %v920_v18  ;;  %v916_v18 = vpack.c.bf16 %v450_v16, %v447_v15  ;;  %v451_v22 = vld [vmem:[#allocation7 + $0x178] sm:$0xff] }
  0x5e   :  { %893 = vmatprep.subr.bf16.mxu0 %v892_v24  ;;  %925 = vmatprep.subr.bf16.mxu1 %v924_v31  ;;  %v918_v24 = vpack.c.bf16 %v449_v19, %v446_v17  ;;  %v948_v26 = vpack.c.bf16 %v451_v22, %v448_v20  ;;  %v705_v22 = vld [vmem:[%s1264_s3 + $0x1] ss:$0 sm:$0xff] }
  0x5f   :  { %247 = vmatmul.mubr.f32.gmra.mrb[2].mxu0 %v1138_v21  ;;  %784 = vmatmul.mubr.f32.gmra.mrb[2].mxu1 %v1146_v25 }
  0x60   :  { %252 = vmatprep.mubr.f32.mxu0 %v1062_v0 }
  0x61   :  { %895 = vmatpush1.bf16.msra.mxu0 %v894_v29  ;;  %927 = vmatpush3.bf16.msra.mxu1 %v924_v31  ;;  %v65_v29 = vadd.s32 8, %v1155_v28  ;;  %v66_v31 = vadd.s32 16, %v1155_v28 }
  0x62   :  { %897 = vmatprep.subr.bf16.mxu0 %v896_v34  ;;  %929 = vmatprep.subr.bf16.mxu1 %v928_v40 }
  0x63   :  { %253 = vmatmul.mubr.f32.gmra.mrb[4].mxu0 %v1140_v23  ;;  %v79_v37 = vand.u32 15, %v65_v29  ;;  %v86_v39 = vand.u32 15, %v66_v31 }
  0x64   :  { %258 = vmatprep.mubr.f32.mxu0 %v1062_v0 }
  0x65   :  { %899 = vmatpush1.bf16.msra.mxu0 %v898_v38  ;;  %931 = vmatpush3.bf16.msra.mxu1 %v928_v40  ;;  %v67_v40 = vadd.s32 24, %v1155_v28  ;;  %vm1166_vm2 = vcmp.le.s32.totalorder %v79_v37, 14  ;;  %vm1170_vm3 = vcmp.ge.s32.totalorder %v86_v39, 1 }
  0x66   :  { %901 = vmatprep.subr.bf16.mxu0 %v900_v43  ;;  %933 = vmatprep.subr.bf16.mxu1 %v932_v49 }
  0x67   :  { %259 = vmatmul.mubr.f32.gmra.mrb[6].mxu0 %v1146_v25  ;;  %v93_v55 = vand.u32 15, %v67_v40 }
  0x68   :  { %516 = vmatprep.mubr.f32.mxu0 %v1062_v0 }
  0x69   :  { %903 = vmatpush1.bf16.msra.mxu0 %v902_v47  ;;  %935 = vmatpush3.bf16.msra.mxu1 %v932_v49  ;;  %vm1187_vm4 = vcmp.le.s32.totalorder %v93_v55, 14 }
  0x6a   :  { %905 = vmatprep.subr.bf16.mxu0 %v904_v53  ;;  %937 = vmatprep.subr.bf16.mxu1 %v936_v59 }
  0x6d   :  { %907 = vmatpush1.bf16.msra.mxu0 %v906_v57  ;;  %939 = vmatpush3.bf16.msra.mxu1 %v936_v59 }
  0x6e   :  { %909 = vmatprep.subr.bf16.mxu0 %v908_v62  ;;  %941 = vmatprep.subr.bf16.mxu1 %v940_v5 }
  0x71   :  { %911 = vmatpush1.bf16.msra.mxu0 %v910_v3  ;;  %943 = vmatpush3.bf16.msra.mxu1 %v940_v5 }
  0x72   :  { %913 = vmatprep.subr.bf16.mxu0 %v912_v8  ;;  %945 = vmatprep.subr.bf16.mxu1 %v944_v14 }
  0x75   :  { %915 = vmatpush1.bf16.msra.mxu0 %v914_v12  ;;  %947 = vmatpush3.bf16.msra.mxu1 %v944_v14 }
  0x76   :  { %917 = vmatprep.subr.bf16.mxu0 %v916_v18  ;;  %949 = vmatprep.subr.bf16.mxu1 %v948_v26 }
  0x79   :  { %919 = vmatpush1.bf16.msra.mxu0 %v918_v24  ;;  %951 = vmatpush3.bf16.msra.mxu1 %v948_v26 }
 0x12e   :  { %v242_v30 = vpop.f32.mrb[0].mxu0  ;;  %v782_v33 = vpop.f32.mrb[0].mxu1 }
 0x12f   :  { %v244_v32 = vpop.f32.mrb[1].mxu0  ;;  %v331_v34 = vpop.f32.mrb[1].mxu1  ;;  %v364_v35 = vrot.slane %v782_v33, 1  ;;  %v350_v41 = vrot.slane %v242_v30, 7 }
 0x130   :  { %v363_v36 = vrot.slane %v331_v34, 1 }
 0x132   :  { %v248_v38 = vpop.f32.mrb[2].mxu0  ;;  %v370_v42 = vsel %vm367_vm0, %v363_v36, %v364_v35  ;;  %v785_v44 = vpop.f32.mrb[2].mxu1 }
 0x133   :  { %v351_v43 = vrot.slane %v248_v38, 7  ;;  %v250_v45 = vpop.f32.mrb[3].mxu0  ;;  %v366_v46 = vrot.slane %v785_v44, 1  ;;  %v341_v47 = vpop.f32.mrb[3].mxu1 }
 0x134   :  { %v365_v51 = vrot.slane %v341_v47, 1 }
 0x135   :  { %v357_v48 = vsel %vm354_vm1, %v350_v41, %v351_v43  ;;  %v371_v56 = vsel %vm367_vm0, %v366_v46, %v363_v36 }
 0x136   :  { %v377_v52 = vadd.f32 %v357_v48, %v250_v45  ;;  %v254_v53 = vpop.f32.mrb[4].mxu0  ;;  %v369_v57 = vsel %vm367_vm0, %v364_v35, %v365_v51  ;;  %v368_v60 = vsel %vm367_vm0, %v365_v51, %v366_v46  ;;  %v375_v13 = vsel %vm1187_vm4, %v371_v56, 0.0 }
 0x137   :  { %v352_v58 = vrot.slane %v254_v53, 7  ;;  %v256_v59 = vpop.f32.mrb[5].mxu0  ;;  %v373_v62 = vsel %vm1166_vm2, %v369_v57, 0.0 }
 0x138   :  { %v381_v63 = vadd.f32 %v377_v52, %v373_v62 }
 0x139   :  { %v356_v1 = vsel %vm354_vm1, %v351_v43, %v352_v58 }
 0x13a   :  { %v361_v2 = vsel %vm1170_vm3, %v356_v1, 0.0  ;;  %v260_v3 = vpop.f32.mrb[6].mxu0  ;;  %v389_v17 = vmul.f32 %v704_v9, %v381_v63 }
 0x13b   :  { %v378_v5 = vadd.f32 %v361_v2, %v256_v59  ;;  %v353_v7 = vrot.slane %v260_v3, 7  ;;  %v262_v8 = vpop.f32.mrb[7].mxu0  ;;  %v707_v2 = vld [vmem:[%s1264_s3 + $0x3] ss:$0 sm:$0xff]  ;;  %s1063_s3 = smov [#allocation8]  }
 0x13c   :  { %v397_v27 = vadd.f32 %v705_v22, %v389_v17  ;;  %s691_s8 = sshll.u32 %s1063_s3, 4  ;;  %s692_s8 = int_to_ptr.vmem [resolvable:$true] %s691_s8 }
 0x13d   :  { %v382_v10 = vadd.f32 %v378_v5, %v368_v60  ;;  %v358_v11 = vsel %vm354_vm1, %v353_v7, %v350_v41  ;;  %v355_v12 = vsel %vm354_vm1, %v352_v58, %v353_v7  ;;  %s1027_s9 = scalar_lea.vmem %s692_s8, 512  ;;  %p1032_p11 = scmp.lt.s32.totalorder %s692_s8, %s692_s8 }
 0x13e   :  { %v359_v14 = vsel %vm1191_vm5, %v358_v11, 0.0  ;;  %v379_v15 = vadd.f32 %v355_v12, %v262_v8  ;;  %v401_v33 = vmax.f32 %v397_v27, 0.0  ;;  %p1028_p10 = scmp.ne.s32.totalorder %s692_s8, %s1027_s9  ;;  %p1033_p12 = scmp.lt.s32.totalorder %s1027_s9, %s1027_s9 }
 0x13f   :  { %v376_v16 = vadd.f32 %v359_v14, %v244_v32  ;;  %v390_v19 = vmul.f32 %v704_v9, %v382_v10 }
 0x140   :  { %v383_v18 = vadd.f32 %v379_v15, %v375_v13  ;;  %p1034_p13 = por %p1033_p12, %p1032_p11 }
 0x141   :  { %v380_v20 = vadd.f32 %v376_v16, %v370_v42  ;;  %v398_v30 = vadd.f32 %v705_v22, %v390_v19 }
 0x142   :  { %v391_v26 = vmul.f32 %v704_v9, %v383_v18  ;;  %p1035_p0 = pnand %p1034_p13, %p1028_p10 }
 0x143   :  { %v388_v24 = vmul.f32 %v704_v9, %v380_v20  ;;  %v402_v35 = vmax.f32 %v398_v30, 0.0 }
 0x144   :  { %v399_v34 = vadd.f32 %v705_v22, %v391_v26 }
 0x145   :  { %v396_v29 = vadd.f32 %v705_v22, %v388_v24 }
 0x146   :  { %v403_v32 = vmax.f32 %v399_v34, 0.0 }
 0x147   :  { %v400_v31 = vmax.f32 %v396_v29, 0.0 }
 0x149   :  { %517 = vmatmul.mubr.f32.vlgmr.msra.gmra.mrb[8].mxu0 %v400_v31  ;;  %818 = vmatprep.mubr.f32.mxu1 %v400_v31 }
 0x14a   :  { %819 = vmatmul.mubr.f32.vlgmr.msra.gmra.mrb[4].mxu1 %v401_v33  ;;  %522 = vmatprep.mubr.f32.mxu0 %v1062_v0 }
 0x14b   :  { %821 = vmatprep.mubr.f32.mxu1 %v402_v35 }
 0x14d   :  { %523 = vmatmul.mubr.f32.gmra.mrb[10].mxu0 %v401_v33 }
 0x14e   :  { %822 = vmatmul.mubr.f32.gmra.mrb[6].mxu1 %v403_v32  ;;  %528 = vmatprep.mubr.f32.mxu0 %v1062_v0 }
 0x151   :  { %529 = vmatmul.mubr.f32.gmra.mrb[12].mxu0 %v402_v35 }
 0x152   :  { %534 = vmatprep.mubr.f32.mxu0 %v1062_v0 }
 0x155   :  { %535 = vmatmul.mubr.f32.gmra.mrb[14].mxu0 %v403_v32 }
 0x21c   :  { %v518_v36 = vpop.f32.mrb[8].mxu0 }
 0x21d   :  { %v520_v37 = vpop.f32.mrb[9].mxu0  ;;  %v820_v38 = vpop.f32.mrb[4].mxu1  ;;  %v626_v43 = vrot.slane %v518_v36, 7 }
 0x21e   :  { %v639_v39 = vrot.slane %v820_v38, 1  ;;  %v607_v40 = vpop.f32.mrb[5].mxu1 }
 0x21f   :  { %v638_v41 = vrot.slane %v607_v40, 1 }
 0x220   :  { %v524_v42 = vpop.f32.mrb[10].mxu0 }
 0x221   :  { %v644_v44 = vsel %vm367_vm0, %v638_v41, %v639_v39  ;;  %v627_v45 = vrot.slane %v524_v42, 7  ;;  %v526_v46 = vpop.f32.mrb[11].mxu0  ;;  %v823_v47 = vpop.f32.mrb[6].mxu1 }
 0x222   :  { %v641_v48 = vrot.slane %v823_v47, 1  ;;  %v617_v51 = vpop.f32.mrb[7].mxu1 }
 0x223   :  { %v632_v0 = vsel %vm354_vm1, %v626_v43, %v627_v45  ;;  %v640_v52 = vrot.slane %v617_v51, 1 }
 0x224   :  { %v651_v53 = vadd.f32 %v632_v0, %v526_v46  ;;  %v530_v55 = vpop.f32.mrb[12].mxu0  ;;  %v645_v56 = vsel %vm367_vm0, %v641_v48, %v638_v41 }
 0x225   :  { %v643_v57 = vsel %vm367_vm0, %v639_v39, %v640_v52  ;;  %v628_v58 = vrot.slane %v530_v55, 7  ;;  %v532_v59 = vpop.f32.mrb[13].mxu0  ;;  %v642_v60 = vsel %vm367_vm0, %v640_v52, %v641_v48  ;;  %v649_v17 = vsel %vm1187_vm4, %v645_v56, 0.0 }
 0x226   :  { %v647_v62 = vsel %vm1166_vm2, %v643_v57, 0.0 }
 0x227   :  { %v655_v63 = vadd.f32 %v651_v53, %v647_v62  ;;  %v631_v1 = vsel %vm354_vm1, %v627_v45, %v628_v58 }
 0x228   :  { %v636_v3 = vsel %vm1170_vm3, %v631_v1, 0.0  ;;  %v536_v5 = vpop.f32.mrb[14].mxu0 }
 0x229   :  { %v663_v7 = vmul.f32 %v706_v61, %v655_v63  ;;  %v652_v8 = vadd.f32 %v636_v3, %v532_v59  ;;  %v629_v9 = vrot.slane %v536_v5, 7  ;;  %v538_v10 = vpop.f32.mrb[15].mxu0 }
 0x22b   :  { %v671_v11 = vadd.f32 %v707_v2, %v663_v7  ;;  %v656_v12 = vadd.f32 %v652_v8, %v642_v60  ;;  %v633_v49 = vsel %vm354_vm1, %v629_v9, %v626_v43  ;;  %v630_v13 = vsel %vm354_vm1, %v628_v58, %v629_v9 }
 0x22c   :  { %v634_v14 = vsel %vm1191_vm5, %v633_v49, 0.0  ;;  %v653_v15 = vadd.f32 %v630_v13, %v538_v10 }
 0x22d   :  { %v664_v16 = vmul.f32 %v706_v61, %v656_v12  ;;  %v650_v54 = vadd.f32 %v634_v14, %v520_v37  ;;  %v675_v18 = vadd.f32 %v671_v11, %v1138_v21 }
 0x22e   :  { %v657_v19 = vadd.f32 %v653_v15, %v649_v17 }
 0x22f   :  { %v672_v20 = vadd.f32 %v707_v2, %v664_v16  ;;  %v654_v22 = vadd.f32 %v650_v54, %v644_v44  ;;  %v679_v24 = vmax.f32 %v675_v18, 0.0 }
 0x230   :  { %v665_v26 = vmul.f32 %v706_v61, %v657_v19 }
 0x231   :  { %v676_v27 = vadd.f32 %v672_v20, %v1140_v23  ;;  %v662_v28 = vmul.f32 %v706_v61, %v654_v22  ;;  %683 = vst [vmem:[#allocation8 + $0x8] sm:$0xff] %v679_v24 }
 0x232   :  { %v673_v29 = vadd.f32 %v707_v2, %v665_v26 }
 0x233   :  { %v680_v6 = vmax.f32 %v676_v27, 0.0  ;;  %v670_v30 = vadd.f32 %v707_v2, %v662_v28 }
 0x234   :  { %v677_v31 = vadd.f32 %v673_v29, %v1146_v25 }
 0x235   :  { %684 = vst [vmem:[#allocation8 + $0x10] sm:$0xff] %v680_v6  ;;  %v674_v4 = vadd.f32 %v670_v30, %v1135_v50 }
 0x236   :  { %v681_v21 = vmax.f32 %v677_v31, 0.0 }
 0x237   :  { %v678_v33 = vmax.f32 %v674_v4, 0.0 }
 0x238   :  { %685 = vst [vmem:[#allocation8 + $0x18] sm:$0xff] %v681_v21 }
 0x239   :  { %682 = vst [vmem:[#allocation8] sm:$0xff] %v678_v33 }
 0x23a   :  { %1038 = shalt.err (!%p1035_p0)
}
 0x23b   :  { %s1039_s12 = scalar_lea.hbm %s1265_s4, 512 }
 0x23c   :  { %p1040_p1 = scmp.ne.s32.totalorder %s1265_s4, %s1039_s12  ;;  %p1043_p2 = scmp.lt.u32.totalorder %s1039_s12, %s1265_s4 }
 0x23e   :  { %p1045_p3 = pnand %p1043_p2, %p1040_p1 }
 0x240   :  { %1048 = shalt.err (!%p1045_p3)
}
 0x241   :  { %697 = dma.vmem_to_hbm [thread:$0]  %s692_s8, 512, %s1265_s4, [#allocation4], %s1059_s1, %s1059_s1, %s1060_s13  }
 0x242   :  { %1053 = dma.done.wait [#allocation4], 512  }
 0x243   :  { %1054 = vsyncadd [#allocation4], 4294966784 }
 0x244   :  { %701 = vsyncpa [#allocation3], 1 }
 0x245   :  { %702 = vsyncpa [#allocation6], 1 }
 0x246   :  { %703 = vsyncpa [#allocation4], 1 }

</bundles_post_ra>
